<compile_context>
chip_gen: v5e
topology: v5e:2x2
jax: 0.10.0
libtpu: 0.0.40
codegen_flags: <defaults>
</compile_context>

<pallas_src>
import functools

import jax
import jax.numpy as jnp
from jax.experimental import pallas as pl
from jax.experimental.pallas import tpu as pltpu

LANE = 128
SUBLANE = 8
TILE_ROWS = 4096        # (4096, 128) f32 = 2 MiB per input per pipeline buffer
CHUNK_ROWS = 256        # in-kernel streaming chunk: 128 KiB f32 intermediates
FAST_PATH_ELEMS = 65536  # below this, plain XLA is faster than a kernel launch


def _huber_kernel(pred_ref, true_ref, out_ref, *, delta, tile_rows, chunk_rows,
                  valid_rows_last, num_blocks):
    i = pl.program_id(0)

    @pl.when(i == 0)
    def _():
        out_ref[...] = jnp.zeros_like(out_ref)

    def chunk_loss(base, rows):
        # Branch-free Huber on a (rows, 128) chunk read straight from the
        # input blocks; rows is always a static multiple of 8.
        p = pred_ref[pl.ds(base, rows), :].astype(jnp.float32)
        t = true_ref[pl.ds(base, rows), :].astype(jnp.float32)
        r = jnp.abs(p - t)
        m = jnp.minimum(r, delta)
        # == where(r < delta, 0.5*r^2, delta*(r - 0.5*delta)) for delta > 0.
        return m * (r - 0.5 * m)

    def partial_sum(loss):
        # Map each group of 8 rows onto one (8,128) vreg tile: pure VPU adds,
        # no cross-lane work.
        return loss.reshape(-1, SUBLANE, LANE).sum(axis=0)

    def process(valid_rows):
        # valid_rows is a static Python int (multiple of 8).  Stream the block
        # through chunk-sized pieces, accumulating in a vreg-resident (8,128)
        # partial; only one read-modify-write of out_ref per block.
        nfull = valid_rows // chunk_rows
        rem = valid_rows % chunk_rows
        acc = jnp.zeros((SUBLANE, LANE), jnp.float32)
        if nfull:
            def body(c, acc):
                base = pl.multiple_of(c * chunk_rows, chunk_rows)
                return acc + partial_sum(chunk_loss(base, chunk_rows))
            acc = jax.lax.fori_loop(0, nfull, body, acc)
        if rem:
            acc = acc + partial_sum(chunk_loss(nfull * chunk_rows, rem))
        out_ref[...] += acc

    if valid_rows_last == tile_rows:
        # Every block is full: single mask-free static path.
        process(tile_rows)
    else:
        # Ragged last block: only process its valid rows (the rest of its VMEM
        # buffer holds unspecified data from the clipped DMA).  No masks.
        @pl.when(i < num_blocks - 1)
        def _():
            process(tile_rows)

        @pl.when(i == num_blocks - 1)
        def _():
            process(valid_rows_last)


def huber_loss(y_pred, y_true, delta, *, tile_rows=None):
    assert y_pred.shape == y_true.shape
    delta = float(delta)
    if not delta > 0.0:
        raise ValueError("HuberLoss requires delta > 0 (as in PyTorch).")
    n_elems = int(y_pred.size)

    # Tiny-input fast path: kernel launch + pipeline fill dominates here.
    if n_elems < FAST_PATH_ELEMS:
        p = y_pred.astype(jnp.float32).reshape(-1)
        t = y_true.astype(jnp.float32).reshape(-1)
        r = jnp.abs(p - t)
        m = jnp.minimum(r, delta)
        return jnp.sum(m * (r - 0.5 * m)) * jnp.float32(1.0 / n_elems)

    p_flat = y_pred.reshape(-1)
    t_flat = y_true.reshape(-1)

    # Dtype-aware row alignment (f32 -> 8 rows, bf16 -> 16, int8/fp8 -> 32) so
    # the (rows, 128) slab tiles cleanly for packed dtypes as well.
    itemsize = jnp.dtype(y_pred.dtype).itemsize
    row_align = SUBLANE * max(1, 4 // itemsize)
    pad = (-n_elems) % (row_align * LANE)
    if pad:
        # Zero pads contribute exactly 0 loss (delta > 0), so no mask needed.
        p_flat = jnp.pad(p_flat, (0, pad))
        t_flat = jnp.pad(t_flat, (0, pad))
    rows = (n_elems + pad) // LANE
    p2 = p_flat.reshape(rows, LANE)
    t2 = t_flat.reshape(rows, LANE)

    max_tile = TILE_ROWS if tile_rows is None else int(tile_rows)
    assert max_tile % row_align == 0
    tile = min(max_tile, rows)
    num_blocks = pl.cdiv(rows, tile)
    valid_rows_last = rows - (num_blocks - 1) * tile  # static, multiple of 8
    chunk = min(CHUNK_ROWS, tile)

    kernel = functools.partial(
        _huber_kernel,
        delta=delta,
        tile_rows=tile,
        chunk_rows=chunk,
        valid_rows_last=valid_rows_last,
        num_blocks=num_blocks,
    )

    # (8,128) partial-sum slab; the output block doubles as the VMEM-resident
    # accumulator across the single "arbitrary" reduction axis.
    partials = pl.pallas_call(
        kernel,
        out_shape=jax.ShapeDtypeStruct((SUBLANE, LANE), jnp.float32),
        grid_spec=pltpu.PrefetchScalarGridSpec(
            num_scalar_prefetch=0,
            grid=(num_blocks,),
            in_specs=[
                pl.BlockSpec((tile, LANE), lambda i: (i, 0)),
                pl.BlockSpec((tile, LANE), lambda i: (i, 0)),
            ],
            out_specs=pl.BlockSpec((SUBLANE, LANE), lambda i: (0, 0)),
        ),
        compiler_params=pltpu.CompilerParams(
            dimension_semantics=("arbitrary",),
        ),
    )(p2, t2)

    # Final tiny reduce (8*128 f32) + multiply by precomputed 1/N.
    return jnp.sum(partials) * jnp.float32(1.0 / n_elems)


def huber_loss_ref(y_pred, y_true, delta):
    r = jnp.abs(y_pred.astype(jnp.float32) - y_true.astype(jnp.float32))
    loss = jnp.where(r < delta, 0.5 * r * r, delta * (r - 0.5 * delta))
    return jnp.mean(loss)


if __name__ == "__main__":
    key = jax.random.PRNGKey(0)
    ks = jax.random.split(key, 8)

    # 1) Module-sized NCHW input (batch=2, channels=4, 16x16): tiny-input path.
    shape1 = (2, 4, 16, 16)
    y_pred1 = jax.random.normal(ks[0], shape1, dtype=jnp.float32)
    y_true1 = jax.random.normal(ks[1], shape1, dtype=jnp.float32)
    out1 = jax.block_until_ready(huber_loss(y_pred1, y_true1, 1.0))
    ref1 = huber_loss_ref(y_pred1, y_true1, 1.0)
    assert jnp.allclose(out1, ref1, rtol=1e-4, atol=1e-6), (out1, ref1)

    # 2) Kernel path, single full block (131072 elems, multiple of 1024).
    shape2 = (8, 16, 32, 32)
    y_pred2 = jax.random.normal(ks[2], shape2, dtype=jnp.float32)
    y_true2 = jax.random.normal(ks[3], shape2, dtype=jnp.float32)
    out2 = jax.block_until_ready(huber_loss(y_pred2, y_true2, 1.0))
    ref2 = huber_loss_ref(y_pred2, y_true2, 1.0)
    assert jnp.allclose(out2, ref2, rtol=1e-4, atol=1e-6), (out2, ref2)

    # 3) Kernel path, ragged element count + multi-block + ragged last block
    #    (exercised at small size via a tile-size override).
    shape3 = (3, 7, 61, 67)   # 85827 elements, not a multiple of 1024
    y_pred3 = jax.random.normal(ks[4], shape3, dtype=jnp.float32)
    y_true3 = jax.random.normal(ks[5], shape3, dtype=jnp.float32)
    out3 = jax.block_until_ready(huber_loss(y_pred3, y_true3, 0.7, tile_rows=512))
    ref3 = huber_loss_ref(y_pred3, y_true3, 0.7)
    assert jnp.allclose(out3, ref3, rtol=1e-4, atol=1e-6), (out3, ref3)

    # 4) Kernel path with default tiling: 2 blocks, ragged last block.
    shape4 = (4, 16, 96, 96)  # 589824 elements -> rows=4608 -> blocks of 4096 + 512
    y_pred4 = jax.random.normal(ks[6], shape4, dtype=jnp.float32)
    y_true4 = jax.random.normal(ks[7], shape4, dtype=jnp.float32)
    out4 = jax.block_until_ready(huber_loss(y_pred4, y_true4, 1.0))
    ref4 = huber_loss_ref(y_pred4, y_true4, 1.0)
    assert jnp.allclose(out4, ref4, rtol=1e-4, atol=1e-6), (out4, ref4)

    print("KERNEL_OK")
</pallas_src>

<mosaic_0001>
module attributes {stable_mosaic.version = 11 : i64} {
  func.func @_huber_kernel(%arg0: i32, %arg1: memref<1024x128xf32, #tpu.memory_space<vmem>>, %arg2: memref<1024x128xf32, #tpu.memory_space<vmem>>, %arg3: memref<8x128xf32, #tpu.memory_space<vmem>>) attributes {dimension_semantics = [#tpu.dimension_semantics<arbitrary>], iteration_bounds = array<i64: 1>, scalar_prefetch = 0 : i64, scratch_operands = 0 : i64, tpu.core_type = #tpu.core_type<tc>, window_params = [{transform_indices = @transform_0, window_bounds = array<i64: 1024, 128>}, {transform_indices = @transform_1, window_bounds = array<i64: 1024, 128>}, {pipeline_mode = #tpu.pipeline_mode<synchronous>, transform_indices = @transform_2, window_bounds = array<i64: 8, 128>}]} {
    %c0_i32 = arith.constant 0 : i32
    %0 = arith.cmpi eq, %arg0, %c0_i32 : i32
    %1 = arith.extui %0 : i1 to i32
    %c0_i32_0 = arith.constant 0 : i32
    %2 = arith.cmpi ne, %1, %c0_i32_0 : i32
    scf.if %2 {
      %cst_6 = arith.constant 0.000000e+00 : f32
      %9 = vector.broadcast %cst_6 : f32 to vector<8x128xf32>
      %c0_7 = arith.constant 0 : index
      %c0_8 = arith.constant 0 : index
      %10 = vector.load %arg3[%c0_7, %c0_8] : memref<8x128xf32, #tpu.memory_space<vmem>>, vector<8x128xf32>
      tpu.vector_store %arg3[%c0_7, %c0_8], %9 {strides = array<i32>} : memref<8x128xf32, #tpu.memory_space<vmem>>, vector<8x128xf32>,
    } else {
    }
    %cst = arith.constant 0.000000e+00 : f32
    %3 = vector.broadcast %cst : f32 to vector<8x128xf32>
    %c0_i32_1 = arith.constant 0 : i32
    %c4_i32 = arith.constant 4 : i32
    %4 = arith.addi %c0_i32_1, %c4_i32 : i32
    %c1_i32 = arith.constant 1 : i32
    %5 = scf.for %arg4 = %c0_i32_1 to %4 step %c1_i32 iter_args(%arg5 = %3) -> (vector<8x128xf32>)  : i32 {
      %c256_i32 = arith.constant 256 : i32
      %9 = arith.muli %arg4, %c256_i32 : i32
      %10 = tpu.assume_multiple %9, 256 : i32
      %11 = arith.index_cast %10 : i32 to index
      %c0_6 = arith.constant 0 : index
      %12 = vector.load %arg1[%11, %c0_6] : memref<1024x128xf32, #tpu.memory_space<vmem>>, vector<256x128xf32>
      %13 = arith.index_cast %10 : i32 to index
      %c0_7 = arith.constant 0 : index
      %14 = vector.load %arg2[%13, %c0_7] : memref<1024x128xf32, #tpu.memory_space<vmem>>, vector<256x128xf32>
      %15 = arith.subf %12, %14 : vector<256x128xf32>
      %16 = math.absf %15 : vector<256x128xf32>
      %cst_8 = arith.constant 1.000000e+00 : f32
      %17 = vector.broadcast %cst_8 : f32 to vector<256x128xf32>
      %18 = arith.minimumf %16, %17 : vector<256x128xf32>
      %cst_9 = arith.constant 5.000000e-01 : f32
      %19 = vector.broadcast %cst_9 : f32 to vector<256x128xf32>
      %20 = arith.mulf %19, %18 : vector<256x128xf32>
      %21 = arith.subf %16, %20 : vector<256x128xf32>
      %22 = arith.mulf %18, %21 : vector<256x128xf32>
      %23 = vector.shape_cast %22 : vector<256x128xf32> to vector<32x8x128xf32>
      %cst_10 = arith.constant dense<0.000000e+00> : vector<8x128xf32>
      %24 = vector.multi_reduction <add>, %23, %cst_10 [0] : vector<32x8x128xf32> to vector<8x128xf32>
      %25 = arith.addf %arg5, %24 : vector<8x128xf32>
      scf.yield %25 : vector<8x128xf32>
    }
    %c4_i32_2 = arith.constant 4 : i32
    %c0 = arith.constant 0 : index
    %c0_3 = arith.constant 0 : index
    %6 = vector.load %arg3[%c0, %c0_3] : memref<8x128xf32, #tpu.memory_space<vmem>>, vector<8x128xf32>
    %7 = arith.addf %6, %5 : vector<8x128xf32>
    %c0_4 = arith.constant 0 : index
    %c0_5 = arith.constant 0 : index
    %8 = vector.load %arg3[%c0_4, %c0_5] : memref<8x128xf32, #tpu.memory_space<vmem>>, vector<8x128xf32>
    tpu.vector_store %arg3[%c0_4, %c0_5], %7 {strides = array<i32>} : memref<8x128xf32, #tpu.memory_space<vmem>>, vector<8x128xf32>,
    return
  }
  func.func @transform_0(%arg0: i32) -> (i32, i32) {
    %c0_i32 = arith.constant 0 : i32
    %c0_i32_0 = arith.constant 0 : i32
    return %arg0, %c0_i32 : i32, i32
  }
  func.func @transform_1(%arg0: i32) -> (i32, i32) {
    %c0_i32 = arith.constant 0 : i32
    %c0_i32_0 = arith.constant 0 : i32
    return %arg0, %c0_i32 : i32, i32
  }
  func.func @transform_2(%arg0: i32) -> (i32, i32) {
    %c0_i32 = arith.constant 0 : i32
    %c0_i32_0 = arith.constant 0 : i32
    %c0_i32_1 = arith.constant 0 : i32
    return %c0_i32, %c0_i32_0 : i32, i32
  }
}

</mosaic_0001>

<bundles_post_ra>
// kernel: tpu_custom_call.1
= control target key start
LH: loop header
LB: loop body
LE: loop exit
PB: predicated region body
PF: predicated region fallthrough
CT: control target
= control target key end

     0   :  { %7 = vsyncpa [#allocation3], 0  ;;  %s696_s0 = inlined_call_operand.hbm [shape: f32[1024,128], index: 0, kind: input, shape index: {}]   ;;  %s697_s1 = inlined_call_operand.hbm [shape: f32[1024,128], index: 1, kind: input, shape index: {}]   ;;  %s698_s2 = inlined_call_operand.hbm [shape: f32[8,128], index: 2, kind: output, shape index: {}]  }
   0x1   :  { %8 = vsyncpa [#allocation6], 0 }
   0x2   :  { %9 = vsyncpa [#allocation4], 0  ;;  %s14_s11 = sshll.u32 %s696_s0, 4  ;;  %s497_s12 = smov [#allocation2]   ;;  %s15_s11 = int_to_ptr.hbm [resolvable:$true] %s14_s11 }
   0x3   :  { %s16_s13 = sshll.u32 %s497_s12, 4  ;;  %s27_s16 = sshll.u32 %s697_s1, 4  ;;  %s17_s13 = int_to_ptr.vmem [resolvable:$true] %s16_s13  ;;  %s28_s16 = int_to_ptr.hbm [resolvable:$true] %s27_s16 }
   0x4   :  { %s498_s17 = smov 128   ;;  %s499_s18 = smov 8  }
   0x5   :  { %22 = dma.hbm_to_vmem [thread:$0]  %s15_s11, 16384, %s17_s13, [#allocation3], %s498_s17, %s498_s17, %s499_s18  }
   0x6   :  { %s500_s19 = smov [#allocation5]  }
   0x7   :  { %s29_s20 = sshll.u32 %s500_s19, 4  ;;  %s30_s20 = int_to_ptr.vmem [resolvable:$true] %s29_s20 }
   0x8   :  { %35 = dma.hbm_to_vmem [thread:$0]  %s28_s16, 16384, %s30_s20, [#allocation6], %s498_s17, %s498_s17, %s499_s18  }
   0x9   :  { %483 = dma.done.wait [#allocation3], 16384  }
   0xa   :  { %484 = vsyncadd [#allocation3], 4294950912 }
   0xb   :  { %485 = dma.done.wait [#allocation6], 16384  }
   0xc   :  { %486 = vsyncadd [#allocation6], 4294950912  ;;  %v501_v0 = vmov 0.0   ;;  %v524_v1 = vmov 0.0   ;;  %s526_s0 = smov 0  }
   0xd   :  { %48 = vst [vmem:[#allocation7] sm:$0xff] %v501_v0 }
   0xe LB: > { %s380_s1 = sshll.u32 %s495_s0, 8  ;;  %s54_s0 = sadd.s32 1, %s495_s0   ;;  %s495_s0 = sphi %s526_s0, %s54_s0   ;;  %v491_v1 = vphi %v524_v1, %v699_v1  }
   0xf   : > { %s535_s21 = scalar_lea.vmem [#allocation2], %s380_s1  ;;  %s539_s22 = scalar_lea.vmem [#allocation5], %s380_s1 }
  0x10   : > { %v58_v2 = vld [vmem:[%s535_s21] sm:$0xff]  ;;  %v59_v3 = vld [vmem:[%s535_s21 + $0x8] sm:$0xff]  ;;  %v60_v6 = vld [vmem:[%s535_s21 + $0x10] sm:$0xff]  ;;  %p51_p0 = scmp.ge.s32.totalorder %s54_s0, 4  }
  0x11   : > { %v91_v4 = vld [vmem:[%s539_s22] sm:$0xff]  ;;  %v92_v5 = vld [vmem:[%s539_s22 + $0x8] sm:$0xff]  ;;  %v93_v7 = vld [vmem:[%s539_s22 + $0x10] sm:$0xff]  ;;  %s357_s25 = sshll.u32 (%p51_p0), %s698_s2, 4  ;;  %s502_s26 = smov (%p51_p0), [#allocation7]   ;;  %s358_s25 = int_to_ptr.hbm [resolvable:$true] %s357_s25 }
  0x12   : > { %v123_v8 = vsub.f32 %v58_v2, %v91_v4  ;;  %v124_v9 = vsub.f32 %v59_v3, %v92_v5  ;;  %v61_v10 = vld [vmem:[%s535_s21 + $0x18] sm:$0xff]  ;;  %v125_v12 = vsub.f32 %v60_v6, %v93_v7  ;;  %v62_v13 = vld [vmem:[%s535_s21 + $0x20] sm:$0xff]  ;;  %v63_v18 = vld [vmem:[%s535_s21 + $0x28] sm:$0xff]  ;;  %s355_s27 = sshll.u32 (%p51_p0), %s502_s26, 4  ;;  %s356_s27 = int_to_ptr.vmem [resolvable:$true] %s355_s27 }
  0x13   : > { %v94_v11 = vld [vmem:[%s539_s22 + $0x18] sm:$0xff]  ;;  %v95_v14 = vld [vmem:[%s539_s22 + $0x20] sm:$0xff]  ;;  %v96_v19 = vld [vmem:[%s539_s22 + $0x28] sm:$0xff] }
  0x14   : > { %v126_v15 = vsub.f32 %v61_v10, %v94_v11  ;;  %v155_v16 = vand.u32 2147483647, %v123_v8  ;;  %v156_v17 = vand.u32 2147483647, %v124_v9  ;;  %v127_v20 = vsub.f32 %v62_v13, %v95_v14  ;;  %v64_v22 = vld [vmem:[%s535_s21 + $0x30] sm:$0xff]  ;;  %v65_v24 = vld [vmem:[%s535_s21 + $0x38] sm:$0xff] }
  0x15   : > { %v157_v21 = vand.u32 2147483647, %v125_v12  ;;  %v97_v23 = vld [vmem:[%s539_s22 + $0x30] sm:$0xff]  ;;  %v98_v25 = vld [vmem:[%s539_s22 + $0x38] sm:$0xff]  ;;  %v128_v26 = vsub.f32 %v63_v18, %v96_v19  ;;  %v66_v33 = vld [vmem:[%s535_s21 + $0x40] sm:$0xff] }
  0x16   : > { %v158_v27 = vand.u32 2147483647, %v126_v15  ;;  %v187_v28 = vmin.f32 %v155_v16, 1.0  ;;  %v188_v29 = vmin.f32 %v156_v17, 1.0  ;;  %v129_v30 = vsub.f32 %v64_v22, %v97_v23  ;;  %v67_v34 = vld [vmem:[%s535_s21 + $0x48] sm:$0xff]  ;;  %v99_v35 = vld [vmem:[%s539_s22 + $0x40] sm:$0xff] }
  0x17   : > { %v555_v31 = vand.u32 2147483647, %v127_v20  ;;  %v189_v32 = vmin.f32 %v157_v21, 1.0  ;;  %v130_v36 = vsub.f32 %v65_v24, %v98_v25  ;;  %v100_v37 = vld [vmem:[%s539_s22 + $0x48] sm:$0xff]  ;;  %v561_v38 = vand.u32 2147483647, %v128_v26 }
  0x18   : > { %v190_v39 = vmin.f32 %v158_v27, 1.0  ;;  %v219_v40 = vmul.f32 0.5, %v187_v28  ;;  %v220_v41 = vmul.f32 0.5, %v188_v29  ;;  %v68_v42 = vld [vmem:[%s535_s21 + $0x50] sm:$0xff]  ;;  %v131_v44 = vsub.f32 %v66_v33, %v99_v35  ;;  %v69_v50 = vld [vmem:[%s535_s21 + $0x58] sm:$0xff]  ;;  %v70_v57 = vld [vmem:[%s535_s21 + $0x60] sm:$0xff] }
  0x19   : > { %v101_v43 = vld [vmem:[%s539_s22 + $0x50] sm:$0xff]  ;;  %v565_v45 = vand.u32 2147483647, %v129_v30  ;;  %v191_v46 = vmin.f32 %v555_v31, 1.0  ;;  %v221_v47 = vmul.f32 0.5, %v189_v32  ;;  %v132_v48 = vsub.f32 %v67_v34, %v100_v37  ;;  %v102_v51 = vld [vmem:[%s539_s22 + $0x58] sm:$0xff] }
  0x1a   : > { %v568_v49 = vand.u32 2147483647, %v130_v36  ;;  %v192_v52 = vmin.f32 %v561_v38, 1.0  ;;  %v222_v53 = vmul.f32 0.5, %v190_v39  ;;  %v251_v54 = vsub.f32 %v155_v16, %v219_v40  ;;  %v103_v58 = vld [vmem:[%s539_s22 + $0x60] sm:$0xff]  ;;  %v71_v3 = vld [vmem:[%s535_s21 + $0x68] sm:$0xff] }
  0x1b   : > { %v252_v55 = vsub.f32 %v156_v17, %v220_v41  ;;  %v133_v56 = vsub.f32 %v68_v42, %v101_v43  ;;  %v575_v59 = vand.u32 2147483647, %v131_v44  ;;  %v193_v60 = vmin.f32 %v565_v45, 1.0  ;;  %v104_v4 = vld [vmem:[%s539_s22 + $0x68] sm:$0xff]  ;;  %v72_v11 = vld [vmem:[%s535_s21 + $0x70] sm:$0xff]  ;;  %v73_v20 = vld [vmem:[%s535_s21 + $0x78] sm:$0xff] }
  0x1c   : > { %v223_v61 = vmul.f32 0.5, %v191_v46  ;;  %v253_v62 = vsub.f32 %v157_v21, %v221_v47  ;;  %v134_v63 = vsub.f32 %v69_v50, %v102_v51  ;;  %v578_v0 = vand.u32 2147483647, %v132_v48  ;;  %v105_v12 = vld [vmem:[%s539_s22 + $0x70] sm:$0xff]  ;;  %v106_v21 = vld [vmem:[%s539_s22 + $0x78] sm:$0xff]  ;;  %v107_v30 = vld [vmem:[%s539_s22 + $0x80] sm:$0xff] }
  0x1d   : > { %v194_v2 = vmin.f32 %v568_v49, 1.0  ;;  %v224_v5 = vmul.f32 0.5, %v192_v52  ;;  %v254_v6 = vsub.f32 %v158_v27, %v222_v53  ;;  %v283_v7 = vmul.f32 %v251_v54, %v187_v28  ;;  %v109_v48 = vld [vmem:[%s539_s22 + $0x90] sm:$0xff] }
  0x1e   : > { %v284_v8 = vmul.f32 %v252_v55, %v188_v29  ;;  %v135_v9 = vsub.f32 %v70_v57, %v103_v58  ;;  %v583_v10 = vand.u32 2147483647, %v133_v56  ;;  %v195_v13 = vmin.f32 %v575_v59, 1.0  ;;  %v74_v29 = vld [vmem:[%s535_s21 + $0x80] sm:$0xff]  ;;  %v110_v57 = vld [vmem:[%s539_s22 + $0x98] sm:$0xff] }
  0x1f   : > { %v225_v14 = vmul.f32 0.5, %v193_v60  ;;  %v255_v15 = vsub.f32 %v555_v31, %v223_v61  ;;  %v285_v16 = vmul.f32 %v253_v62, %v189_v32  ;;  %v136_v17 = vsub.f32 %v71_v3, %v104_v4 }
  0x20   : > { %v589_v18 = vand.u32 2147483647, %v134_v63  ;;  %v196_v19 = vmin.f32 %v578_v0, 1.0  ;;  %v226_v22 = vmul.f32 0.5, %v194_v2  ;;  %v256_v23 = vsub.f32 %v561_v38, %v224_v5  ;;  %v75_v38 = vld [vmem:[%s535_s21 + $0x88] sm:$0xff]  ;;  %v111_v5 = vld [vmem:[%s539_s22 + $0xa0] sm:$0xff] }
  0x21   : > { %v286_v24 = vmul.f32 %v254_v6, %v190_v39  ;;  %v315_v25 = vadd.f32 %v284_v8, %v283_v7  ;;  %v137_v26 = vsub.f32 %v72_v11, %v105_v12  ;;  %v595_v27 = vand.u32 2147483647, %v135_v9  ;;  %v108_v39 = vld [vmem:[%s539_s22 + $0x88] sm:$0xff] }
  0x22   : > { %v197_v28 = vmin.f32 %v583_v10, 1.0  ;;  %v227_v31 = vmul.f32 0.5, %v195_v13  ;;  %v257_v32 = vsub.f32 %v565_v45, %v225_v14  ;;  %v287_v33 = vmul.f32 %v255_v15, %v191_v46  ;;  %v76_v46 = vld [vmem:[%s535_s21 + $0x90] sm:$0xff]  ;;  %v112_v14 = vld [vmem:[%s539_s22 + $0xa8] sm:$0xff] }
  0x23   : > { %v316_v34 = vadd.f32 %v315_v25, %v285_v16  ;;  %v138_v35 = vsub.f32 %v73_v20, %v106_v21  ;;  %v601_v36 = vand.u32 2147483647, %v136_v17  ;;  %v198_v37 = vmin.f32 %v589_v18, 1.0 }
  0x24   : > { %v228_v40 = vmul.f32 0.5, %v196_v19  ;;  %v258_v41 = vsub.f32 %v568_v49, %v226_v22  ;;  %v288_v42 = vmul.f32 %v256_v23, %v192_v52  ;;  %v139_v44 = vsub.f32 %v74_v29, %v107_v30  ;;  %v77_v52 = vld [vmem:[%s535_s21 + $0x98] sm:$0xff]  ;;  %v113_v23 = vld [vmem:[%s539_s22 + $0xb0] sm:$0xff] }
  0x25   : > { %v317_v43 = vadd.f32 %v316_v34, %v286_v24  ;;  %v607_v47 = vand.u32 2147483647, %v137_v26  ;;  %v199_v45 = vmin.f32 %v595_v27, 1.0  ;;  %v229_v50 = vmul.f32 0.5, %v197_v28 }
  0x26   : > { %v259_v51 = vsub.f32 %v575_v59, %v227_v31  ;;  %v289_v53 = vmul.f32 %v257_v32, %v193_v60  ;;  %v140_v55 = vsub.f32 %v75_v38, %v108_v39  ;;  %v613_v56 = vand.u32 2147483647, %v138_v35  ;;  %v78_v60 = vld [vmem:[%s535_s21 + $0xa0] sm:$0xff]  ;;  %v114_v32 = vld [vmem:[%s539_s22 + $0xb8] sm:$0xff] }
  0x27   : > { %v318_v54 = vadd.f32 %v317_v43, %v287_v33  ;;  %v200_v49 = vmin.f32 %v601_v36, 1.0  ;;  %v230_v58 = vmul.f32 0.5, %v198_v37  ;;  %v260_v61 = vsub.f32 %v578_v0, %v228_v40 }
  0x28   : > { %v290_v62 = vmul.f32 %v258_v41, %v194_v2  ;;  %v141_v3 = vsub.f32 %v76_v46, %v109_v48  ;;  %v619_v4 = vand.u32 2147483647, %v139_v44  ;;  %v201_v59 = vmin.f32 %v607_v47, 1.0  ;;  %v79_v2 = vld [vmem:[%s535_s21 + $0xa8] sm:$0xff]  ;;  %v115_v41 = vld [vmem:[%s539_s22 + $0xc0] sm:$0xff] }
  0x29   : > { %v319_v63 = vadd.f32 %v318_v54, %v288_v42  ;;  %v231_v6 = vmul.f32 0.5, %v199_v45  ;;  %v261_v7 = vsub.f32 %v583_v10, %v229_v50  ;;  %v291_v8 = vmul.f32 %v259_v51, %v195_v13  ;;  %v80_v13 = vld [vmem:[%s535_s21 + $0xb0] sm:$0xff]  ;;  %v116_v51 = vld [vmem:[%s539_s22 + $0xc8] sm:$0xff] }
  0x2a   : > { %v142_v11 = vsub.f32 %v77_v52, %v110_v57  ;;  %v625_v12 = vand.u32 2147483647, %v140_v55  ;;  %v202_v0 = vmin.f32 %v613_v56, 1.0  ;;  %v232_v15 = vmul.f32 0.5, %v200_v49 }
  0x2b   : > { %v320_v9 = vadd.f32 %v319_v63, %v289_v53  ;;  %v262_v16 = vsub.f32 %v589_v18, %v230_v58  ;;  %v292_v17 = vmul.f32 %v260_v61, %v196_v19  ;;  %v143_v21 = vsub.f32 %v78_v60, %v111_v5  ;;  %v81_v19 = vld [vmem:[%s535_s21 + $0xb8] sm:$0xff]  ;;  %v117_v61 = vld [vmem:[%s539_s22 + $0xd0] sm:$0xff] }
  0x2c   : > { %v631_v22 = vand.u32 2147483647, %v141_v3  ;;  %v203_v10 = vmin.f32 %v619_v4, 1.0  ;;  %v233_v24 = vmul.f32 0.5, %v201_v59  ;;  %v263_v25 = vsub.f32 %v595_v27, %v231_v6 }
  0x2d   : > { %v321_v20 = vadd.f32 %v320_v9, %v290_v62  ;;  %v293_v26 = vmul.f32 %v261_v7, %v197_v28  ;;  %v144_v30 = vsub.f32 %v79_v2, %v112_v14  ;;  %v637_v31 = vand.u32 2147483647, %v142_v11  ;;  %v82_v28 = vld [vmem:[%s535_s21 + $0xc0] sm:$0xff]  ;;  %v118_v7 = vld [vmem:[%s539_s22 + $0xd8] sm:$0xff] }
  0x2e   : > { %v204_v18 = vmin.f32 %v625_v12, 1.0  ;;  %v234_v33 = vmul.f32 0.5, %v202_v0  ;;  %v264_v34 = vsub.f32 %v601_v36, %v232_v15  ;;  %v294_v35 = vmul.f32 %v262_v16, %v198_v37  ;;  %v83_v37 = vld [vmem:[%s535_s21 + $0xc8] sm:$0xff]  ;;  %v119_v16 = vld [vmem:[%s539_s22 + $0xe0] sm:$0xff] }
  0x2f   : > { %v322_v29 = vadd.f32 %v321_v20, %v291_v8  ;;  %v145_v39 = vsub.f32 %v80_v13, %v113_v23  ;;  %v643_v40 = vand.u32 2147483647, %v143_v21  ;;  %v205_v27 = vmin.f32 %v631_v22, 1.0 }
  0x30   : > { %v235_v42 = vmul.f32 0.5, %v203_v10  ;;  %v265_v43 = vsub.f32 %v607_v47, %v233_v24  ;;  %v295_v44 = vmul.f32 %v263_v25, %v199_v45  ;;  %v146_v48 = vsub.f32 %v81_v19, %v114_v32  ;;  %v84_v45 = vld [vmem:[%s535_s21 + $0xd0] sm:$0xff]  ;;  %v120_v25 = vld [vmem:[%s539_s22 + $0xe8] sm:$0xff] }
  0x31   : > { %v323_v38 = vadd.f32 %v322_v29, %v292_v17  ;;  %v649_v50 = vand.u32 2147483647, %v144_v30  ;;  %v206_v36 = vmin.f32 %v637_v31, 1.0  ;;  %v236_v53 = vmul.f32 0.5, %v204_v18 }
  0x32   : > { %v266_v54 = vsub.f32 %v613_v56, %v234_v33  ;;  %v296_v55 = vmul.f32 %v264_v34, %v200_v49  ;;  %v147_v57 = vsub.f32 %v82_v28, %v115_v41  ;;  %v655_v58 = vand.u32 2147483647, %v145_v39  ;;  %v85_v49 = vld [vmem:[%s535_s21 + $0xd8] sm:$0xff]  ;;  %v88_v34 = vld [vmem:[%s535_s21 + $0xf0] sm:$0xff] }
  0x33   : > { %v324_v46 = vadd.f32 %v323_v38, %v293_v26  ;;  %v207_v47 = vmin.f32 %v643_v40, 1.0  ;;  %v237_v62 = vmul.f32 0.5, %v205_v27  ;;  %v267_v63 = vsub.f32 %v619_v4, %v235_v42 }
  0x34   : > { %v297_v3 = vmul.f32 %v265_v43, %v201_v59  ;;  %v148_v5 = vsub.f32 %v83_v37, %v116_v51  ;;  %v661_v6 = vand.u32 2147483647, %v146_v48  ;;  %v208_v56 = vmin.f32 %v649_v50, 1.0  ;;  %v86_v59 = vld [vmem:[%s535_s21 + $0xe0] sm:$0xff] }
  0x35   : > { %v325_v52 = vadd.f32 %v324_v46, %v294_v35  ;;  %v238_v8 = vmul.f32 0.5, %v206_v36  ;;  %v268_v9 = vsub.f32 %v625_v12, %v236_v53  ;;  %v298_v11 = vmul.f32 %v266_v54, %v202_v0  ;;  %v87_v0 = vld [vmem:[%s535_s21 + $0xe8] sm:$0xff]  ;;  %v122_v46 = vld [vmem:[%s539_s22 + $0xf8] sm:$0xff] }
  0x36   : > { %v149_v14 = vsub.f32 %v84_v45, %v117_v61  ;;  %v667_v15 = vand.u32 2147483647, %v147_v57  ;;  %v209_v4 = vmin.f32 %v655_v58, 1.0  ;;  %v239_v17 = vmul.f32 0.5, %v207_v47 }
  0x37   : > { %v326_v60 = vadd.f32 %v325_v52, %v295_v44  ;;  %v269_v20 = vsub.f32 %v631_v22, %v237_v62  ;;  %v299_v21 = vmul.f32 %v267_v63, %v203_v10  ;;  %v150_v23 = vsub.f32 %v85_v49, %v118_v7  ;;  %v121_v10 = vld [vmem:[%s539_s22 + $0xf0] sm:$0xff]  ;;  %v89_v44 = vld [vmem:[%s535_s21 + $0xf8] sm:$0xff] }
  0x38   : > { %v180_v24 = vand.u32 2147483647, %v148_v5  ;;  %v210_v12 = vmin.f32 %v661_v6, 1.0  ;;  %v240_v26 = vmul.f32 0.5, %v208_v56  ;;  %v270_v29 = vsub.f32 %v637_v31, %v238_v8 }
  0x39   : > { %v327_v2 = vadd.f32 %v326_v60, %v296_v55  ;;  %v300_v30 = vmul.f32 %v268_v9, %v204_v18  ;;  %v151_v32 = vsub.f32 %v86_v59, %v119_v16  ;;  %v181_v33 = vand.u32 2147483647, %v149_v14 }
  0x3a   : > { %v211_v22 = vmin.f32 %v667_v15, 1.0  ;;  %v241_v35 = vmul.f32 0.5, %v209_v4  ;;  %v271_v38 = vsub.f32 %v643_v40, %v239_v17  ;;  %v301_v39 = vmul.f32 %v269_v20, %v205_v27 }
  0x3b   : > { %v328_v13 = vadd.f32 %v327_v2, %v297_v3  ;;  %v152_v41 = vsub.f32 %v87_v0, %v120_v25  ;;  %v182_v42 = vand.u32 2147483647, %v150_v23  ;;  %v212_v43 = vmin.f32 %v180_v24, 1.0 }
  0x3c   : > { %v242_v31 = vmul.f32 0.5, %v210_v12  ;;  %v272_v18 = vsub.f32 %v649_v50, %v240_v26  ;;  %v302_v48 = vmul.f32 %v270_v29, %v206_v36  ;;  %v153_v51 = vsub.f32 %v88_v34, %v121_v10 }
  0x3d   : > { %v329_v19 = vadd.f32 %v328_v13, %v298_v11  ;;  %v183_v53 = vand.u32 2147483647, %v151_v32  ;;  %v213_v54 = vmin.f32 %v181_v33, 1.0  ;;  %v243_v55 = vmul.f32 0.5, %v211_v22 }
  0x3e   : > { %v273_v52 = vsub.f32 %v655_v58, %v241_v35  ;;  %v303_v57 = vmul.f32 %v271_v38, %v207_v47  ;;  %v154_v27 = vsub.f32 %v89_v44, %v122_v46  ;;  %v184_v45 = vand.u32 2147483647, %v152_v41  ;;  %v347_v44 = vld [vmem:[#allocation7] sm:$0xff] (%p51_p0) }
  0x3f   : > { %v330_v28 = vadd.f32 %v329_v19, %v299_v21  ;;  %v214_v61 = vmin.f32 %v182_v42, 1.0  ;;  %v244_v62 = vmul.f32 0.5, %v212_v43  ;;  %v274_v63 = vsub.f32 %v661_v6, %v242_v31 }
  0x40   : > { %v304_v3 = vmul.f32 %v272_v18, %v208_v56  ;;  %v185_v5 = vand.u32 2147483647, %v153_v51  ;;  %v215_v50 = vmin.f32 %v183_v53, 1.0  ;;  %v245_v36 = vmul.f32 0.5, %v213_v54 }
  0x41   : > { %v331_v37 = vadd.f32 %v330_v28, %v300_v30  ;;  %v275_v49 = vsub.f32 %v667_v15, %v243_v55  ;;  %v305_v7 = vmul.f32 %v273_v52, %v209_v4  ;;  %v186_v9 = vand.u32 2147483647, %v154_v27 }
  0x42   : > { %v216_v11 = vmin.f32 %v184_v45, 1.0  ;;  %v246_v58 = vmul.f32 0.5, %v214_v61  ;;  %v276_v47 = vsub.f32 %v180_v24, %v244_v62  ;;  %v306_v2 = vmul.f32 %v274_v63, %v210_v12 }
  0x43   : > { %v332_v40 = vadd.f32 %v331_v37, %v301_v39  ;;  %v217_v59 = vmin.f32 %v185_v5, 1.0  ;;  %v247_v16 = vmul.f32 0.5, %v215_v50  ;;  %v277_v17 = vsub.f32 %v181_v33, %v245_v36 }
  0x44   : > { %v307_v20 = vmul.f32 %v275_v49, %v211_v22  ;;  %v218_v56 = vmin.f32 %v186_v9, 1.0  ;;  %v248_v21 = vmul.f32 0.5, %v216_v11  ;;  %v278_v13 = vsub.f32 %v182_v42, %v246_v58 }
  0x45   : > { %v333_v60 = vadd.f32 %v332_v40, %v302_v48  ;;  %v308_v23 = vmul.f32 %v276_v47, %v212_v43  ;;  %v249_v25 = vmul.f32 0.5, %v217_v59  ;;  %v279_v15 = vsub.f32 %v183_v53, %v247_v16 }
  0x46   : > { %v309_v4 = vmul.f32 %v277_v17, %v213_v54  ;;  %v250_v29 = vmul.f32 0.5, %v218_v56  ;;  %v280_v30 = vsub.f32 %v184_v45, %v248_v21  ;;  %v310_v19 = vmul.f32 %v278_v13, %v214_v61 }
  0x47   : > { %v334_v8 = vadd.f32 %v333_v60, %v303_v57  ;;  %v281_v12 = vsub.f32 %v185_v5, %v249_v25  ;;  %v311_v32 = vmul.f32 %v279_v15, %v215_v50 }
  0x48   : > { %v282_v10 = vsub.f32 %v186_v9, %v250_v29  ;;  %v312_v33 = vmul.f32 %v280_v30, %v216_v11 }
  0x49   : > { %v335_v14 = vadd.f32 %v334_v8, %v304_v3  ;;  %v313_v35 = vmul.f32 %v281_v12, %v217_v59 }
  0x4a   : > { %v314_v39 = vmul.f32 %v282_v10, %v218_v56 }
  0x4b   : > { %v336_v6 = vadd.f32 %v335_v14, %v305_v7 }
  0x4d   : > { %v337_v0 = vadd.f32 %v336_v6, %v306_v2 }
  0x4f   : > { %v338_v26 = vadd.f32 %v337_v0, %v307_v20 }
  0x51   : > { %v339_v24 = vadd.f32 %v338_v26, %v308_v23 }
  0x53   : > { %v340_v34 = vadd.f32 %v339_v24, %v309_v4 }
  0x55   : > { %v341_v22 = vadd.f32 %v340_v34, %v310_v19 }
  0x57   : > { %v342_v38 = vadd.f32 %v341_v22, %v311_v32 }
  0x59   : > { %v343_v28 = vadd.f32 %v342_v38, %v312_v33 }
  0x5b   : > { %v344_v41 = vadd.f32 %v343_v28, %v313_v35 }
  0x5d   : > { %v345_v42 = vadd.f32 %v344_v41, %v314_v39  ;;  %53 = sbr.rel (!%p51_p0) target bundleno = 14 (0xe), region = 49 }
  0x5f   : > { %v346_v43 = vadd.f32 %v491_v1, %v345_v42  }
  0x61   : > { %v699_v1 = vmov %v346_v43  ;;  %v348_v46 = vadd.f32 (%p51_p0), %v347_v44, %v346_v43 }
  0x63   :  { %349 = vst [vmem:[#allocation7] sm:$0xff] %v348_v46 }
  0x64   :  { %360 = dma.vmem_to_hbm [thread:$0]  %s356_s27, 128, %s358_s25, [#allocation4]  }
  0x65   :  { %487 = dma.done.wait [#allocation4], 128  }
  0x66   :  { %488 = vsyncadd [#allocation4], 4294967168 }
  0x67   :  { %365 = vsyncpa [#allocation3], 1 }
  0x68   :  { %366 = vsyncpa [#allocation6], 1 }
  0x69   :  { %367 = vsyncpa [#allocation4], 1 }

</bundles_post_ra>
